<compile_context>
chip_gen: v5e
topology: v5e:2x2
jax: 0.10.0
libtpu: 0.0.40
codegen_flags: <defaults>
</compile_context>

<pallas_src>
import jax
import jax.numpy as jnp
from jax.experimental import pallas as pl
from jax.experimental.pallas import tpu as pltpu

INPUT_SIZE = 4
HIDDEN_SIZE = 10
NUM_CLASSES = 3
LANE = 128


def _mlp_kernel(x_ref, w1_ref, b1_ref, w2t_ref, b2_ref, out_ref):
    """One batch tile. Lane-major: batch is the last (lane) axis everywhere.

    x_ref:   [INPUT_SIZE,  TB]          activations (batch on lanes)
    w1_ref:  [HIDDEN_SIZE, INPUT_SIZE]  torch nn.Linear layout
    b1_ref:  [HIDDEN_SIZE, 1]
    w2t_ref: [HIDDEN_SIZE, NUM_CLASSES] (torch w2 transposed once at trace time)
    b2_ref:  [NUM_CLASSES, 1]
    out_ref: [NUM_CLASSES, TB]
    """
    x = x_ref[...]
    w1 = w1_ref[...]
    w2t = w2t_ref[...]

    # layer 1: h = relu(W1 @ x + b1). K=4 contraction unrolled as VPU
    # broadcast-FMAs; bias folded into the first step. w1 columns are
    # lane-broadcasts (replicated layout), x rows are sublane-broadcasts.
    h = w1[:, 0:1] * x[0:1, :] + b1_ref[...]
    for k in range(1, INPUT_SIZE):
        h = h + w1[:, k:k + 1] * x[k:k + 1, :]
    h = jnp.maximum(h, 0.0)                                   # [HIDDEN_SIZE, TB]

    # layer 2: out[c, :] = sum_j w2[c, j] * h[j, :] + b2[c].
    # Scale + cross-sublane-reduce form: 3 VPU muls on fully-utilized [10,TB]
    # operands and 3 XLU sublane reductions, instead of 10 broadcast-FMAs on a
    # 3/8-utilized [3,TB] vreg (and no per-j sublane broadcasts of h).
    cols = []
    for c in range(NUM_CLASSES):
        t = w2t[:, c:c + 1] * h                               # [HIDDEN_SIZE, TB]
        cols.append(jnp.sum(t, axis=0, keepdims=True))        # [1, TB]
    out = jnp.concatenate(cols, axis=0) + b2_ref[...]         # [NUM_CLASSES, TB]

    out_ref[...] = out.astype(out_ref.dtype)


def _round_up(n, m):
    return ((n + m - 1) // m) * m


def _cdiv(a, b):
    return (a + b - 1) // b


def _pick_tile(batch, batch_tile):
    """Pick (lane_tile, padded_batch). The tile is a multiple of 128 lanes and the
    grid gets >= 2 (even) steps whenever batch > 128 so both v7x TensorCores can
    be used via dimension_semantics=("parallel",)."""
    batch_tile = max(LANE, (batch_tile // LANE) * LANE)        # multiple of 128
    b128 = _round_up(batch, LANE)
    if b128 <= LANE:
        return LANE, LANE                                      # single tiny tile
    n_steps = max(2, _cdiv(b128, batch_tile))
    if n_steps % 2:
        n_steps += 1                                           # even split over 2 TCs
    tb = _round_up(_cdiv(b128, n_steps), LANE)
    return tb, n_steps * tb


def neural_net_forward_lane_major(x_t, w1, b1, w2, b2, *, batch_tile=32768):
    """Core entry point (no wrapper transposes).

    x_t: [INPUT_SIZE, B] f32 activations with batch already on the lane axis.
    w1: [HIDDEN_SIZE, INPUT_SIZE], b1: [HIDDEN_SIZE],
    w2: [NUM_CLASSES, HIDDEN_SIZE], b2: [NUM_CLASSES] (torch nn.Linear layout).
    Returns logits lane-major: [NUM_CLASSES, B].
    """
    batch = x_t.shape[1]
    tb, b_pad = _pick_tile(batch, batch_tile)

    if b_pad != batch:
        # Zero-pad batch lanes up to the tile grid. NOTE: padded columns hold junk
        # (relu(b1) -> W2.relu(b1)+b2); they are sliced off below and must never be
        # reduced over upstream.
        x_t = jnp.pad(x_t, ((0, 0), (0, b_pad - batch)))

    w2_t = w2.T                                   # [HIDDEN_SIZE, NUM_CLASSES], tiny
    b1_2d = b1.reshape(HIDDEN_SIZE, 1)
    b2_2d = b2.reshape(NUM_CLASSES, 1)

    grid = (b_pad // tb,)

    out_t = pl.pallas_call(
        _mlp_kernel,
        out_shape=jax.ShapeDtypeStruct((NUM_CLASSES, b_pad), x_t.dtype),
        grid=grid,
        in_specs=[
            # batch-tiled activations: only the lane (batch) block advances
            pl.BlockSpec((INPUT_SIZE, tb), lambda i: (0, i)),
            # weights/biases: constant index maps -> VMEM-resident across steps
            pl.BlockSpec((HIDDEN_SIZE, INPUT_SIZE), lambda i: (0, 0)),
            pl.BlockSpec((HIDDEN_SIZE, 1), lambda i: (0, 0)),
            pl.BlockSpec((HIDDEN_SIZE, NUM_CLASSES), lambda i: (0, 0)),
            pl.BlockSpec((NUM_CLASSES, 1), lambda i: (0, 0)),
        ],
        out_specs=pl.BlockSpec((NUM_CLASSES, tb), lambda i: (0, i)),
        compiler_params=pltpu.CompilerParams(
            # batch tiles are independent -> shard the grid over v7x's 2 TCs
            dimension_semantics=("parallel",),
            # double-buffered in+out blocks at tb=32768 are ~4 MiB; 32 MiB is ample
            # headroom and compiles identically on v5e/v6e/v7x
            vmem_limit_bytes=32 * 1024 * 1024,
        ),
    )(x_t, w1, b1_2d, w2_t, b2_2d)

    if b_pad != batch:
        out_t = out_t[:, :batch]
    return out_t


def neural_net_forward(x, w1, b1, w2, b2, *, batch_tile=32768):
    """Torch-layout convenience wrapper: x [B, INPUT_SIZE] -> [B, NUM_CLASSES].
    Does exactly one transpose in and one out; performance-sensitive callers should
    keep activations lane-major and use neural_net_forward_lane_major directly."""
    out_t = neural_net_forward_lane_major(x.T, w1, b1, w2, b2, batch_tile=batch_tile)
    return out_t.T


def _reference_forward(x, w1, b1, w2, b2):
    p = jax.lax.Precision.HIGHEST
    h = jnp.maximum(jnp.dot(x, w1.T, precision=p) + b1, 0.0)
    return jnp.dot(h, w2.T, precision=p) + b2


if __name__ == "__main__":
    key = jax.random.PRNGKey(0)
    k_x, k_w1, k_b1, k_w2, k_b2 = jax.random.split(key, 5)

    # Deterministic parameter init (uniform, like torch's default Linear range).
    bound1 = 1.0 / (INPUT_SIZE ** 0.5)
    w1 = jax.random.uniform(k_w1, (HIDDEN_SIZE, INPUT_SIZE), jnp.float32, -bound1, bound1)
    b1 = jax.random.uniform(k_b1, (HIDDEN_SIZE,), jnp.float32, -bound1, bound1)
    bound2 = 1.0 / (HIDDEN_SIZE ** 0.5)
    w2 = jax.random.uniform(k_w2, (NUM_CLASSES, HIDDEN_SIZE), jnp.float32, -bound2, bound2)
    b2 = jax.random.uniform(k_b2, (NUM_CLASSES,), jnp.float32, -bound2, bound2)

    # 1) Torch-layout path, small demo batch (single 128-lane tile, grid=(1,)).
    batch = 8
    x = jax.random.normal(k_x, (batch, INPUT_SIZE), dtype=jnp.float32)
    out = jax.block_until_ready(neural_net_forward(x, w1, b1, w2, b2))
    ref = _reference_forward(x, w1, b1, w2, b2)
    assert out.shape == (batch, NUM_CLASSES)
    assert jnp.allclose(out, ref, atol=1e-5, rtol=1e-5), "mismatch vs reference (batch=8)"

    # 2) Lane-major path (no wrapper transposes), batch=300 -> tb=256, grid=(2,):
    #    exercises the >=2-step parallel grid and the lane-padding path.
    batch2 = 300
    x2_t = jax.random.normal(k_x, (INPUT_SIZE, batch2), dtype=jnp.float32)
    out2_t = jax.block_until_ready(neural_net_forward_lane_major(x2_t, w1, b1, w2, b2))
    ref2 = _reference_forward(x2_t.T, w1, b1, w2, b2)
    assert out2_t.shape == (NUM_CLASSES, batch2)
    assert jnp.allclose(out2_t.T, ref2, atol=1e-5, rtol=1e-5), "mismatch vs reference (batch=300)"

    print("KERNEL_OK")
</pallas_src>

<mosaic_0001>
module attributes {stable_mosaic.version = 11 : i64} {
  func.func @_mlp_kernel(%arg0: i32, %arg1: memref<4x128xf32, #tpu.memory_space<vmem>>, %arg2: memref<10x4xf32, #tpu.memory_space<vmem>>, %arg3: memref<10x1xf32, #tpu.memory_space<vmem>>, %arg4: memref<10x3xf32, #tpu.memory_space<vmem>>, %arg5: memref<3x1xf32, #tpu.memory_space<vmem>>, %arg6: memref<3x128xf32, #tpu.memory_space<vmem>>) attributes {dimension_semantics = [#tpu.dimension_semantics<parallel>], iteration_bounds = array<i64: 1>, scalar_prefetch = 0 : i64, scratch_operands = 0 : i64, tpu.core_type = #tpu.core_type<tc>, window_params = [{transform_indices = @transform_0, window_bounds = array<i64: 4, 128>}, {pipeline_mode = #tpu.pipeline_mode<synchronous>, transform_indices = @transform_1, window_bounds = array<i64: 10, 4>}, {pipeline_mode = #tpu.pipeline_mode<synchronous>, transform_indices = @transform_2, window_bounds = array<i64: 10, 1>}, {pipeline_mode = #tpu.pipeline_mode<synchronous>, transform_indices = @transform_3, window_bounds = array<i64: 10, 3>}, {pipeline_mode = #tpu.pipeline_mode<synchronous>, transform_indices = @transform_4, window_bounds = array<i64: 3, 1>}, {transform_indices = @transform_5, window_bounds = array<i64: 3, 128>}]} {
    %c0 = arith.constant 0 : index
    %c0_0 = arith.constant 0 : index
    %0 = vector.load %arg1[%c0, %c0_0] : memref<4x128xf32, #tpu.memory_space<vmem>>, vector<4x128xf32>
    %c0_1 = arith.constant 0 : index
    %c0_2 = arith.constant 0 : index
    %1 = vector.load %arg2[%c0_1, %c0_2] : memref<10x4xf32, #tpu.memory_space<vmem>>, vector<10x4xf32>
    %c0_3 = arith.constant 0 : index
    %c0_4 = arith.constant 0 : index
    %2 = vector.load %arg4[%c0_3, %c0_4] : memref<10x3xf32, #tpu.memory_space<vmem>>, vector<10x3xf32>
    %3 = vector.extract_strided_slice %1 {offsets = [0, 0], sizes = [10, 1], strides = [1, 1]} : vector<10x4xf32> to vector<10x1xf32>
    %4 = vector.extract_strided_slice %0 {offsets = [0, 0], sizes = [1, 128], strides = [1, 1]} : vector<4x128xf32> to vector<1x128xf32>
    %5 = vector.broadcast %3 : vector<10x1xf32> to vector<10x128xf32>
    %6 = vector.broadcast %4 : vector<1x128xf32> to vector<10x128xf32>
    %7 = arith.mulf %5, %6 : vector<10x128xf32>
    %c0_5 = arith.constant 0 : index
    %c0_6 = arith.constant 0 : index
    %8 = vector.load %arg3[%c0_5, %c0_6] : memref<10x1xf32, #tpu.memory_space<vmem>>, vector<10x1xf32>
    %9 = vector.broadcast %8 : vector<10x1xf32> to vector<10x128xf32>
    %10 = arith.addf %7, %9 : vector<10x128xf32>
    %11 = vector.extract_strided_slice %1 {offsets = [0, 1], sizes = [10, 1], strides = [1, 1]} : vector<10x4xf32> to vector<10x1xf32>
    %12 = vector.extract_strided_slice %0 {offsets = [1, 0], sizes = [1, 128], strides = [1, 1]} : vector<4x128xf32> to vector<1x128xf32>
    %13 = vector.broadcast %11 : vector<10x1xf32> to vector<10x128xf32>
    %14 = vector.broadcast %12 : vector<1x128xf32> to vector<10x128xf32>
    %15 = arith.mulf %13, %14 : vector<10x128xf32>
    %16 = arith.addf %10, %15 : vector<10x128xf32>
    %17 = vector.extract_strided_slice %1 {offsets = [0, 2], sizes = [10, 1], strides = [1, 1]} : vector<10x4xf32> to vector<10x1xf32>
    %18 = vector.extract_strided_slice %0 {offsets = [2, 0], sizes = [1, 128], strides = [1, 1]} : vector<4x128xf32> to vector<1x128xf32>
    %19 = vector.broadcast %17 : vector<10x1xf32> to vector<10x128xf32>
    %20 = vector.broadcast %18 : vector<1x128xf32> to vector<10x128xf32>
    %21 = arith.mulf %19, %20 : vector<10x128xf32>
    %22 = arith.addf %16, %21 : vector<10x128xf32>
    %23 = vector.extract_strided_slice %1 {offsets = [0, 3], sizes = [10, 1], strides = [1, 1]} : vector<10x4xf32> to vector<10x1xf32>
    %24 = vector.extract_strided_slice %0 {offsets = [3, 0], sizes = [1, 128], strides = [1, 1]} : vector<4x128xf32> to vector<1x128xf32>
    %25 = vector.broadcast %23 : vector<10x1xf32> to vector<10x128xf32>
    %26 = vector.broadcast %24 : vector<1x128xf32> to vector<10x128xf32>
    %27 = arith.mulf %25, %26 : vector<10x128xf32>
    %28 = arith.addf %22, %27 : vector<10x128xf32>
    %cst = arith.constant 0.000000e+00 : f32
    %29 = vector.broadcast %cst : f32 to vector<10x128xf32>
    %30 = arith.maximumf %28, %29 : vector<10x128xf32>
    %31 = vector.extract_strided_slice %2 {offsets = [0, 0], sizes = [10, 1], strides = [1, 1]} : vector<10x3xf32> to vector<10x1xf32>
    %32 = vector.broadcast %31 : vector<10x1xf32> to vector<10x128xf32>
    %33 = arith.mulf %32, %30 : vector<10x128xf32>
    %cst_7 = arith.constant dense<0.000000e+00> : vector<128xf32>
    %34 = vector.multi_reduction <add>, %33, %cst_7 [0] : vector<10x128xf32> to vector<128xf32>
    %35 = vector.shape_cast %34 : vector<128xf32> to vector<1x128xf32>
    %36 = vector.extract_strided_slice %2 {offsets = [0, 1], sizes = [10, 1], strides = [1, 1]} : vector<10x3xf32> to vector<10x1xf32>
    %37 = vector.broadcast %36 : vector<10x1xf32> to vector<10x128xf32>
    %38 = arith.mulf %37, %30 : vector<10x128xf32>
    %cst_8 = arith.constant dense<0.000000e+00> : vector<128xf32>
    %39 = vector.multi_reduction <add>, %38, %cst_8 [0] : vector<10x128xf32> to vector<128xf32>
    %40 = vector.shape_cast %39 : vector<128xf32> to vector<1x128xf32>
    %41 = vector.extract_strided_slice %2 {offsets = [0, 2], sizes = [10, 1], strides = [1, 1]} : vector<10x3xf32> to vector<10x1xf32>
    %42 = vector.broadcast %41 : vector<10x1xf32> to vector<10x128xf32>
    %43 = arith.mulf %42, %30 : vector<10x128xf32>
    %cst_9 = arith.constant dense<0.000000e+00> : vector<128xf32>
    %44 = vector.multi_reduction <add>, %43, %cst_9 [0] : vector<10x128xf32> to vector<128xf32>
    %45 = vector.shape_cast %44 : vector<128xf32> to vector<1x128xf32>
    %46 = tpu.concatenate %35, %40, %45 in 0 : vector<1x128xf32>, vector<1x128xf32>, vector<1x128xf32> -> vector<3x128xf32>
    %c0_10 = arith.constant 0 : index
    %c0_11 = arith.constant 0 : index
    %47 = vector.load %arg5[%c0_10, %c0_11] : memref<3x1xf32, #tpu.memory_space<vmem>>, vector<3x1xf32>
    %48 = vector.broadcast %47 : vector<3x1xf32> to vector<3x128xf32>
    %49 = arith.addf %46, %48 : vector<3x128xf32>
    %c0_12 = arith.constant 0 : index
    %c0_13 = arith.constant 0 : index
    %50 = vector.load %arg6[%c0_12, %c0_13] : memref<3x128xf32, #tpu.memory_space<vmem>>, vector<3x128xf32>
    tpu.vector_store %arg6[%c0_12, %c0_13], %49 {strides = array<i32>} : memref<3x128xf32, #tpu.memory_space<vmem>>, vector<3x128xf32>,
    return
  }
  func.func @transform_0(%arg0: i32) -> (i32, i32) {
    %c0_i32 = arith.constant 0 : i32
    %c0_i32_0 = arith.constant 0 : i32
    return %c0_i32, %arg0 : i32, i32
  }
  func.func @transform_1(%arg0: i32) -> (i32, i32) {
    %c0_i32 = arith.constant 0 : i32
    %c0_i32_0 = arith.constant 0 : i32
    %c0_i32_1 = arith.constant 0 : i32
    return %c0_i32, %c0_i32_0 : i32, i32
  }
  func.func @transform_2(%arg0: i32) -> (i32, i32) {
    %c0_i32 = arith.constant 0 : i32
    %c0_i32_0 = arith.constant 0 : i32
    %c0_i32_1 = arith.constant 0 : i32
    return %c0_i32, %c0_i32_0 : i32, i32
  }
  func.func @transform_3(%arg0: i32) -> (i32, i32) {
    %c0_i32 = arith.constant 0 : i32
    %c0_i32_0 = arith.constant 0 : i32
    %c0_i32_1 = arith.constant 0 : i32
    return %c0_i32, %c0_i32_0 : i32, i32
  }
  func.func @transform_4(%arg0: i32) -> (i32, i32) {
    %c0_i32 = arith.constant 0 : i32
    %c0_i32_0 = arith.constant 0 : i32
    %c0_i32_1 = arith.constant 0 : i32
    return %c0_i32, %c0_i32_0 : i32, i32
  }
  func.func @transform_5(%arg0: i32) -> (i32, i32) {
    %c0_i32 = arith.constant 0 : i32
    %c0_i32_0 = arith.constant 0 : i32
    return %c0_i32, %arg0 : i32, i32
  }
}

</mosaic_0001>

<bundles_post_ra>
// kernel: tpu_custom_call.1
= control target key start
LH: loop header
LB: loop body
LE: loop exit
PB: predicated region body
PF: predicated region fallthrough
CT: control target
= control target key end

     0   :  { %v223_v2 = vmov 0   ;;  %s289_s0 = inlined_call_operand.vmem [shape: f32[4,128], index: 0, kind: input, shape index: {}]   ;;  %s290_s1 = inlined_call_operand.vmem [shape: f32[10,4], index: 1, kind: input, shape index: {}]   ;;  %s291_s2 = inlined_call_operand.vmem [shape: f32[10,1], index: 2, kind: input, shape index: {}]   ;;  %s292_s3 = inlined_call_operand.vmem [shape: f32[10,3], index: 3, kind: input, shape index: {}]   ;;  %s293_s4 = inlined_call_operand.vmem [shape: f32[3,1], index: 4, kind: input, shape index: {}]   ;;  %s294_s5 = inlined_call_operand.hbm [shape: f32[3,128], index: 5, kind: output, shape index: {}]  }
   0x1   :  { %v39_v0 = vld [vmem:[%s291_s2] sm:$0xff]  ;;  %184 = vset.pattern.permute.xlu1 %v223_v2  ;;  %183 = vset.pattern.permute.xlu0 %v223_v2 }
   0x2   :  { %v22_v1 = vld [vmem:[%s290_s1] sm:$0xff]  ;;  %43 = vperm.xlu1 %184, %v39_v0  }
   0x3   :  { %28 = vperm.xlu0 %183, %v22_v1  }
   0x4   :  { %10 = vsyncpa [#allocation3], 0  ;;  %v224_v3 = vmov 1   ;;  %v40_v4 = vld [vmem:[%s291_s2 + $0x8] sm:$0x3]  ;;  %v225_v6 = vmov 2  }
   0x5   :  { %185 = vset.pattern.permute.xlu2 %v224_v3  ;;  %v23_v5 = vld [vmem:[%s290_s1 + $0x8] sm:$0x3]  ;;  %v226_v7 = vmov 3   ;;  %v24_v9 = vld [vmem:[%s292_s3] sm:$0xff]  ;;  %vm106_vm0 = vcmask 1041408   ;;  %vm151_vm1 = vcmask 1040384  }
   0x6   :  { %54 = vperm.xlu2 %185, %v22_v1   ;;  %v25_v8 = vld [vmem:[%s292_s3 + $0x8] sm:$0x3]  ;;  %v154_v10 = vld [vmem:[%s293_s4] sm:$0x7]  ;;  %s169_s8 = sshll.u32 %s294_s5, 4  ;;  %s170_s8 = int_to_ptr.hbm [resolvable:$true] %s169_s8 }
   0x7   :  { %v21_v15 = vld [vmem:[%s289_s0] sm:$0xf]  ;;  %s227_s0 = smov [#allocation2]  }
   0x8   :  { %v36_v16 = vperm.slane %v21_v15, 0  ;;  %v61_v20 = vperm.slane %v21_v15, 1  ;;  %v87_v22 = vperm.slane %v21_v15, 3  ;;  %v74_v24 = vperm.slane %v21_v15, 2  ;;  %s167_s4 = sshll.u32 %s227_s0, 4  ;;  %s168_s4 = int_to_ptr.vmem [resolvable:$true] %s167_s4 }
   0xa   :  { %48 = vperm.xlu1 %184, %v40_v4  }
   0xb   :  { %33 = vperm.xlu0 %183, %v23_v5  }
   0xe   :  { %58 = vperm.xlu2 %185, %v23_v5  }
  0x12   :  { %187 = vset.pattern.permute.xlu1 %v225_v6 }
  0x13   :  { %186 = vset.pattern.permute.xlu0 %v225_v6  ;;  %67 = vperm.xlu1 %187, %v22_v1  }
  0x14   :  { %71 = vperm.xlu0 %186, %v23_v5  }
  0x16   :  { %188 = vset.pattern.permute.xlu2 %v226_v7 }
  0x17   :  { %84 = vperm.xlu2 %188, %v23_v5  }
  0x1b   :  { %189 = vset.pattern.permute.xlu1 %v226_v7 }
  0x1c   :  { %191 = vset.pattern.permute.xlu0 %v224_v3  ;;  %80 = vperm.xlu1 %189, %v22_v1  }
  0x1d   :  { %120 = vperm.xlu0 %191, %v25_v8  }
  0x1f   :  { %190 = vset.pattern.permute.xlu2 %v223_v2 }
  0x20   :  { %101 = vperm.xlu2 %190, %v25_v8  }
  0x24   :  { %192 = vset.pattern.permute.xlu1 %v223_v2 }
  0x25   :  { %196 = vset.pattern.permute.xlu0 %v223_v2  ;;  %96 = vperm.xlu1 %192, %v24_v9  }
  0x26   :  { %157 = vperm.xlu0 %196, %v154_v10  }
  0x28   :  { %193 = vset.pattern.permute.xlu2 %v224_v3 }
  0x29   :  { %116 = vperm.xlu2 %193, %v24_v9  }
  0x2d   :  { %194 = vset.pattern.permute.xlu1 %v225_v6 }
  0x2e   :  { %138 = vperm.xlu1 %194, %v25_v8  }
  0x31   :  { %195 = vset.pattern.permute.xlu2 %v225_v6 }
  0x32   :  { %134 = vperm.xlu2 %195, %v24_v9  }
  0x60   :  { %v55_v11 = vpop.permute.xlu2 %54 }
  0x61   :  { %v62_v33 = vmul.f32 %v61_v20, %v55_v11 }
  0x68   :  { %v59_v14 = vpop.permute.xlu2 %58 }
  0x69   :  { %v63_v25 = vmul.f32 %v61_v20, %v59_v14 }
  0x71   :  { %v85_v21 = vpop.permute.xlu2 %84 }
  0x72   :  { %v89_v29 = vmul.f32 %v87_v22, %v85_v21 }
  0x74   :  { %v44_v12 = vpop.permute.xlu1 %43 }
  0x75   :  { %v29_v13 = vpop.permute.xlu0 %28 }
  0x76   :  { %v37_v26 = vmul.f32 %v36_v16, %v29_v13 }
  0x78   :  { %v51_v34 = vadd.f32 %v44_v12, %v37_v26 }
  0x7a   :  { %v102_v35 = vpop.permute.xlu2 %101  ;;  %v64_v38 = vadd.f32 %v62_v33, %v51_v34 }
  0x7c   :  { %v49_v17 = vpop.permute.xlu1 %48 }
  0x7d   :  { %v34_v18 = vpop.permute.xlu0 %33 }
  0x7e   :  { %v38_v19 = vmul.f32 %v36_v16, %v34_v18 }
  0x80   :  { %v52_v23 = vadd.f32 %v49_v17, %v38_v19 }
  0x82   :  { %v65_v30 = vadd.f32 %v63_v25, %v52_v23 }
  0x83   :  { %v117_v47 = vpop.permute.xlu2 %116 }
  0x85   :  { %v68_v27 = vpop.permute.xlu1 %67 }
  0x86   :  { %v72_v28 = vpop.permute.xlu0 %71  ;;  %v75_v37 = vmul.f32 %v74_v24, %v68_v27 }
  0x87   :  { %v76_v31 = vmul.f32 %v74_v24, %v72_v28 }
  0x88   :  { %v77_v41 = vadd.f32 %v75_v37, %v64_v38 }
  0x89   :  { %v78_v32 = vadd.f32 %v76_v31, %v65_v30 }
  0x8b   :  { %v91_v36 = vadd.f32 %v89_v29, %v78_v32 }
  0x8c   :  { %v135_v60 = vpop.permute.xlu2 %134 }
  0x8d   :  { %v93_v40 = vmax.f32 %v91_v36, 0.0 }
  0x8e   :  { %v81_v39 = vpop.permute.xlu1 %80 }
  0x8f   :  { %v88_v42 = vmul.f32 %v87_v22, %v81_v39  ;;  %v121_v43 = vpop.permute.xlu0 %120  ;;  %v105_v49 = vmul.f32 %v102_v35, %v93_v40 }
  0x90   :  { %v124_v45 = vmul.f32 %v121_v43, %v93_v40 }
  0x91   :  { %v90_v44 = vadd.f32 %v88_v42, %v77_v41  ;;  %v107_v54 = vsel %vm106_vm0, %v105_v49, 0.0 }
  0x92   :  { %v125_v50 = vsel %vm106_vm0, %v124_v45, 0.0 }
  0x93   :  { %v92_v46 = vmax.f32 %v90_v44, 0.0 }
  0x95   :  { %v123_v48 = vmul.f32 %v117_v47, %v92_v46  ;;  %v141_v0 = vmul.f32 %v135_v60, %v92_v46 }
  0x97   :  { %v126_v51 = vadd.f32 %v125_v50, %v123_v48  ;;  %v97_v52 = vpop.permute.xlu1 %96 }
  0x98   :  { %v104_v53 = vmul.f32 %v97_v52, %v92_v46  ;;  %v158_v15 = vpop.permute.xlu0 %157 }
  0x99   :  { %v127_v56 = vrot.slane %v126_v51, 4 }
  0x9a   :  { %v108_v55 = vadd.f32 %v107_v54, %v104_v53 }
  0x9b   :  { %v128_v59 = vadd.f32 %v127_v56, %v126_v51 }
  0x9c   :  { %v109_v57 = vrot.slane %v108_v55, 4 }
  0x9d   :  { %v129_v1 = vrot.slane %v128_v59, 2 }
  0x9e   :  { %v110_v58 = vadd.f32 %v109_v57, %v108_v55 }
  0x9f   :  { %v130_v6 = vadd.f32 %v129_v1, %v128_v59 }
  0xa0   :  { %v139_v61 = vpop.permute.xlu1 %138  ;;  %v111_v62 = vrot.slane %v110_v58, 2 }
  0xa1   :  { %v142_v63 = vmul.f32 %v139_v61, %v93_v40  ;;  %v131_v10 = vrot.slane %v130_v6, 1 }
  0xa2   :  { %v112_v4 = vadd.f32 %v111_v62, %v110_v58 }
  0xa3   :  { %v143_v2 = vsel %vm106_vm0, %v142_v63, 0.0  ;;  %v132_v14 = vadd.f32 %v131_v10, %v130_v6 }
  0xa4   :  { %v144_v3 = vadd.f32 %v143_v2, %v141_v0  ;;  %v113_v8 = vrot.slane %v112_v4, 1 }
  0xa6   :  { %v145_v5 = vrot.slane %v144_v3, 4  ;;  %v114_v12 = vadd.f32 %v113_v8, %v112_v4 }
  0xa8   :  { %v146_v7 = vadd.f32 %v145_v5, %v144_v3  ;;  %v152_v17 = vsel %vm151_vm1, %v114_v12, %v132_v14 }
  0xaa   :  { %v147_v9 = vrot.slane %v146_v7, 2 }
  0xac   :  { %v148_v11 = vadd.f32 %v147_v9, %v146_v7 }
  0xae   :  { %v149_v13 = vrot.slane %v148_v11, 1 }
  0xb0   :  { %v150_v16 = vadd.f32 %v149_v13, %v148_v11 }
  0xb2   :  { %v153_v18 = vsel %vm106_vm0, %v152_v17, %v150_v16 }
  0xb3   :  { %v160_v19 = vadd.f32 %v158_v15, %v153_v18 }
  0xb5   :  { %161 = vst [vmem:[#allocation2] sm:$0x7] %v160_v19 }
  0xb6   :  { %172 = dma.vmem_to_hbm [thread:$0]  %s168_s4, 64, %s170_s8, [#allocation3]  }
  0xb7   :  { %221 = dma.done.wait [#allocation3], 64  }
  0xb8   :  { %222 = vsyncadd [#allocation3], 4294967232 }
  0xb9   :  { %177 = vsyncpa [#allocation3], 1 }

</bundles_post_ra>
